<compile_context>
chip_gen: v6e
topology: v6e:2x2x1
jax: 0.10.0
libtpu: 0.0.40
codegen_flags: <defaults>
</compile_context>

<pallas_src>
import functools

import jax
import jax.numpy as jnp
import numpy as np
from jax import lax
from jax.experimental import pallas as pl
from jax.experimental.pallas import tpu as pltpu


def _round_up(n: int, m: int) -> int:
    return ((n + m - 1) // m) * m


def _sublane_multiple(dtype) -> int:
    """Minimum second-to-last tile dim for this dtype (packed sublanes)."""
    itemsize = jnp.dtype(dtype).itemsize
    return max(8, 32 // itemsize)  # 8 for f32, 16 for bf16, 32 for int8/fp8


def _pick_k_tiling(K: int, tk_pref: int):
    """Returns (tk, Kp). tk always divides Kp; Kp == K unless K is large & ragged."""
    if K <= tk_pref:
        return K, K  # single K block spanning the full (possibly ragged) extent
    Kp = _round_up(K, 128)
    tk = 128
    for cand in range(min(tk_pref, Kp), 127, -128):
        if Kp % cand == 0:
            tk = cand
            break
    return tk, Kp


def _mm_kernel_acc(x_ref, w_ref, o_ref, acc_ref):
    """(tm, tn) output tile; grid axis 2 (k) is the reduction axis.

    w_ref tile is (tn, tk) in the native nn.Linear (N, K) layout; we contract
    on the last dim of both operands so no weight transpose ever hits HBM.
    """
    k = pl.program_id(2)
    part = lax.dot_general(
        x_ref[...],
        w_ref[...],
        dimension_numbers=(((1,), (1,)), ((), ())),
        preferred_element_type=jnp.float32,
    )

    @pl.when(k == 0)
    def _():
        acc_ref[...] = part  # overwrite: saves the zero-fill pass

    @pl.when(k > 0)
    def _():
        acc_ref[...] += part

    @pl.when(k == pl.num_programs(2) - 1)
    def _():
        o_ref[...] = acc_ref[...].astype(o_ref.dtype)


def _mm_kernel_single_k(x_ref, w_ref, o_ref):
    """Whole reduction fits one K block: no scratch accumulator needed."""
    o_ref[...] = lax.dot_general(
        x_ref[...],
        w_ref[...],
        dimension_numbers=(((1,), (1,)), ((), ())),
        preferred_element_type=jnp.float32,
    ).astype(o_ref.dtype)


def _pallas_matmul(x2d, weight, *, tm_pref=512, tn_pref=512, tk_pref=1024):
    """x2d: (M, K); weight: (N, K) in nn.Linear layout. Returns (M, N) = x2d @ weight.T."""
    M, K = x2d.shape
    N, K2 = weight.shape
    assert K == K2

    sub = _sublane_multiple(x2d.dtype)

    # --- reduction (K) tiling: the only axis that ever needs zero padding ---
    tk, Kp = _pick_k_tiling(K, tk_pref)
    if Kp != K:
        # Garbage in padded K positions would corrupt the reduction, so pad
        # with zeros. Only happens for large, non-128-multiple K.
        x2d = jnp.pad(x2d, ((0, 0), (0, Kp - K)))
        weight = jnp.pad(weight, ((0, 0), (0, Kp - K)))

    # --- M tiling (no padding; boundary rows are don't-care and discarded) ---
    tm = min(tm_pref, _round_up(M, sub))

    # --- N tiling (no padding; boundary cols are don't-care and discarded) ---
    if N < 128:
        tn = N  # block dim equals full array dim -> allowed even if ragged
    else:
        tn = min(tn_pref, _round_up(N, 128))

    # Keep >=2 "parallel" tiles so both v7x TensorCores are used on small shapes.
    if pl.cdiv(M, tm) * pl.cdiv(N, tn) == 1 and N % 256 == 0:
        tn = N // 2

    grid_m = pl.cdiv(M, tm)
    grid_n = pl.cdiv(N, tn)
    grid_k = Kp // tk

    compiler_params = pltpu.CompilerParams(
        dimension_semantics=("parallel", "parallel", "arbitrary")[: (2 if grid_k == 1 else 3)],
        vmem_limit_bytes=48 * 1024 * 1024,  # safe on v5e/v6e/v7x; >> ~11 MiB used
    )
    out_shape = jax.ShapeDtypeStruct((M, N), x2d.dtype)

    if grid_k == 1:
        return pl.pallas_call(
            _mm_kernel_single_k,
            out_shape=out_shape,
            grid_spec=pltpu.PrefetchScalarGridSpec(
                num_scalar_prefetch=0,
                grid=(grid_m, grid_n),
                in_specs=[
                    pl.BlockSpec((tm, tk), lambda i, j: (i, 0)),
                    pl.BlockSpec((tn, tk), lambda i, j: (j, 0)),
                ],
                out_specs=pl.BlockSpec((tm, tn), lambda i, j: (i, j)),
            ),
            compiler_params=compiler_params,
        )(x2d, weight)

    return pl.pallas_call(
        _mm_kernel_acc,
        out_shape=out_shape,
        grid_spec=pltpu.PrefetchScalarGridSpec(
            num_scalar_prefetch=0,
            grid=(grid_m, grid_n, grid_k),
            in_specs=[
                pl.BlockSpec((tm, tk), lambda i, j, k: (i, k)),
                pl.BlockSpec((tn, tk), lambda i, j, k: (j, k)),
            ],
            out_specs=pl.BlockSpec((tm, tn), lambda i, j, k: (i, j)),
            scratch_shapes=[pltpu.VMEM((tm, tn), jnp.float32)],
        ),
        compiler_params=compiler_params,
    )(x2d, weight)


@functools.partial(jax.jit, static_argnames=("n_heads", "out_features", "dim"))
def multi_head_linear(x, weight, *, n_heads: int, out_features: int, dim: int):
    """Pallas-backed forward of MultiHeadLinear.

    x:      (..., in_features)
    weight: (n_heads * out_features, in_features)   (nn.Linear layout, bias=False)
    """
    in_features = x.shape[-1]
    N = n_heads * out_features
    assert weight.shape == (N, in_features)

    lead_shape = x.shape[:-1]
    M = int(np.prod(lead_shape)) if lead_shape else 1
    x2d = x.reshape(M, in_features)

    # Weight stays in its native (N, K) layout — no per-call HBM transpose.
    y = _pallas_matmul(x2d, weight)  # (M, N)

    out = y.reshape(*lead_shape, n_heads, out_features)

    # Move the heads axis (currently at -2) to position `dim`, as in PyTorch.
    ndim = out.ndim
    d = dim % ndim
    heads_axis = ndim - 2
    if d != heads_axis:
        perm = [ax for ax in range(ndim) if ax != heads_axis]
        perm.insert(d, heads_axis)
        out = jnp.transpose(out, perm)
    # TODO(synk): when out_features % 128 == 0 this permute could be folded into
    # the kernel out_specs (write head-major blocks directly, tn = out_features).
    return out


def _reference(x, weight, *, n_heads, out_features, dim):
    """Pure-JAX reference mirroring the PyTorch forward."""
    y = jnp.einsum("...k,nk->...n", x, weight)
    out = y.reshape(*x.shape[:-1], n_heads, out_features)
    ndim = out.ndim
    d = dim % ndim
    heads_axis = ndim - 2
    perm = [ax for ax in range(ndim) if ax != heads_axis]
    perm.insert(d, heads_axis)
    return jnp.transpose(out, perm)


if __name__ == "__main__":
    # Small shapes consistent with the module: batch=2, seq=8, hidden(in_features)=32,
    # n_heads=4, out_features=8, head axis placed at dim=1.
    n_heads, in_features, out_features, dim = 4, 32, 8, 1

    key = jax.random.PRNGKey(0)
    kx, kw = jax.random.split(key)
    x = jax.random.normal(kx, (2, 8, in_features), dtype=jnp.float32)
    weight = jax.random.normal(
        kw, (n_heads * out_features, in_features), dtype=jnp.float32
    ) * (1.0 / np.sqrt(in_features))

    out = multi_head_linear(
        x, weight, n_heads=n_heads, out_features=out_features, dim=dim
    )
    out = jax.block_until_ready(out)

    ref = _reference(
        x, weight, n_heads=n_heads, out_features=out_features, dim=dim
    )
    assert out.shape == (2, n_heads, 8, out_features), out.shape
    np.testing.assert_allclose(np.asarray(out), np.asarray(ref), rtol=1e-5, atol=1e-5)

    print("KERNEL_OK")
</pallas_src>

<mosaic_0001>
module attributes {stable_mosaic.version = 11 : i64} {
  func.func @_mm_kernel_single_k(%arg0: i32, %arg1: i32, %arg2: memref<16x32xf32, #tpu.memory_space<vmem>>, %arg3: memref<32x32xf32, #tpu.memory_space<vmem>>, %arg4: memref<16x32xf32, #tpu.memory_space<vmem>>) attributes {dimension_semantics = [#tpu.dimension_semantics<parallel>, #tpu.dimension_semantics<parallel>], iteration_bounds = array<i64: 1, 1>, scalar_prefetch = 0 : i64, scratch_operands = 0 : i64, tpu.core_type = #tpu.core_type<tc>, window_params = [{transform_indices = @transform_0, window_bounds = array<i64: 16, 32>}, {transform_indices = @transform_1, window_bounds = array<i64: 32, 32>}, {transform_indices = @transform_2, window_bounds = array<i64: 16, 32>}]} {
    %c0 = arith.constant 0 : index
    %c0_0 = arith.constant 0 : index
    %0 = vector.load %arg2[%c0, %c0_0] : memref<16x32xf32, #tpu.memory_space<vmem>>, vector<16x32xf32>
    %c0_1 = arith.constant 0 : index
    %c0_2 = arith.constant 0 : index
    %1 = vector.load %arg3[%c0_1, %c0_2] : memref<32x32xf32, #tpu.memory_space<vmem>>, vector<32x32xf32>
    %cst = arith.constant dense<0.000000e+00> : vector<16x32xf32>
    %2 = tpu.matmul %0, %1, %cst {dimension_numbers = #tpu.dot_dimension_numbers<[1], [1], [0], [0], [0, 0, 1, 0], [], []>} : vector<16x32xf32>, vector<32x32xf32>, vector<16x32xf32> -> vector<16x32xf32>
    %c0_3 = arith.constant 0 : index
    %c0_4 = arith.constant 0 : index
    %3 = vector.load %arg4[%c0_3, %c0_4] : memref<16x32xf32, #tpu.memory_space<vmem>>, vector<16x32xf32>
    tpu.vector_store %arg4[%c0_3, %c0_4], %2 {strides = array<i32>} : memref<16x32xf32, #tpu.memory_space<vmem>>, vector<16x32xf32>,
    return
  }
  func.func @transform_0(%arg0: i32, %arg1: i32) -> (i32, i32) {
    %c0_i32 = arith.constant 0 : i32
    %c0_i32_0 = arith.constant 0 : i32
    return %arg0, %c0_i32 : i32, i32
  }
  func.func @transform_1(%arg0: i32, %arg1: i32) -> (i32, i32) {
    %c0_i32 = arith.constant 0 : i32
    %c0_i32_0 = arith.constant 0 : i32
    return %arg1, %c0_i32 : i32, i32
  }
  func.func @transform_2(%arg0: i32, %arg1: i32) -> (i32, i32) {
    %c0_i32 = arith.constant 0 : i32
    return %arg0, %arg1 : i32, i32
  }
}

</mosaic_0001>

<bundles_post_ra>
// kernel: multi_head_linear.1
= control target key start
LH: loop header
LB: loop body
LE: loop exit
PB: predicated region body
PF: predicated region fallthrough
CT: control target
= control target key end

     0   :  { %7 = vsyncpa [#allocation3], 0  ;;  %s261_s0 = inlined_call_operand.hbm [shape: f32[16,32], index: 0, kind: input, shape index: {}]   ;;  %s262_s1 = inlined_call_operand.hbm [shape: f32[32,32], index: 1, kind: input, shape index: {}]   ;;  %s263_s2 = inlined_call_operand.vmem [shape: f32[16,32], index: 2, kind: output, shape index: {}]  }
   0x1   :  { %8 = vsyncpa [#allocation5], 0  ;;  %s218_s9 = smov [#allocation2]  }
   0x2   :  { %s14_s10 = sshll.u32 %s218_s9, 4  ;;  %s15_s10 = int_to_ptr.vmem [resolvable:$true] %s14_s10 }
   0x3   :  { %s182_s11 = scalar_lea.vmem %s15_s10, 256  ;;  %p187_p1 = scmp.lt.s32.totalorder %s15_s10, %s15_s10 }
   0x4   :  { %p183_p0 = scmp.ne.s32.totalorder %s15_s10, %s182_s11  ;;  %p188_p2 = scmp.lt.s32.totalorder %s182_s11, %s182_s11 }
   0x6   :  { %p189_p3 = por %p188_p2, %p187_p1 }
   0x8   :  { %p190_p4 = pnand %p189_p3, %p183_p0 }
   0xa   :  { %193 = shalt.err (!%p190_p4)
}
   0xb   :  { %s219_s12 = smov 128   ;;  %s220_s13 = smov 8  }
   0xc   :  { %20 = dma.hbm_to_vmem [thread:$0]  %s261_s0, 256, %s15_s10, [#allocation3], %s219_s12, %s219_s12, %s220_s13  }
   0xd   :  { %s221_s16 = smov [#allocation4]  }
   0xe   :  { %s26_s17 = sshll.u32 %s221_s16, 4  ;;  %s27_s17 = int_to_ptr.vmem [resolvable:$true] %s26_s17 }
   0xf   :  { %s202_s18 = scalar_lea.vmem %s27_s17, 512  ;;  %p207_p6 = scmp.lt.s32.totalorder %s27_s17, %s27_s17 }
  0x10   :  { %p203_p5 = scmp.ne.s32.totalorder %s27_s17, %s202_s18  ;;  %p208_p7 = scmp.lt.s32.totalorder %s202_s18, %s202_s18 }
  0x12   :  { %p209_p8 = por %p208_p7, %p207_p6 }
  0x14   :  { %p210_p9 = pnand %p209_p8, %p203_p5 }
  0x16   :  { %213 = shalt.err (!%p210_p9)
}
  0x17   :  { %32 = dma.hbm_to_vmem [thread:$0]  %s262_s1, 512, %s27_s17, [#allocation5], %s219_s12, %s219_s12, %s220_s13  }
  0x18   :  { %214 = dma.done.wait [#allocation3], 256  }
  0x19   :  { %215 = vsyncadd [#allocation3], 4294967040 }
  0x1a   :  { %216 = dma.done.wait [#allocation5], 512  }
  0x1b   :  { %217 = vsyncadd [#allocation5], 4294966784  ;;  %vm45_vm0 = vcmask 261120   ;;  %v44_v0 = vld [vmem:[#allocation4 + $0x18] sm:$0xff]  ;;  %v43_v1 = vld [vmem:[#allocation4 + $0x10] sm:$0xff] }
  0x1c   :  { %159 = vmatprep.subr.msk.mxu0 %vm45_vm0, %v44_v0  ;;  %v39_v2 = vld [vmem:[#allocation2] sm:$0xff]  ;;  %v42_v3 = vld [vmem:[#allocation4 + $0x8] sm:$0xff]  ;;  %v41_v4 = vld [vmem:[#allocation4] sm:$0xff] }
  0x1d   :  { %160 = vmatpush3.xpose.msk.msra.mxu0 %vm45_vm0, %v44_v0  ;;  %167 = vmatprep.mubr.msk.f32.mxu0 %vm45_vm0, %v39_v2  ;;  %v40_v5 = vld [vmem:[#allocation2 + $0x8] sm:$0xff] }
  0x1e   :  { %161 = vmatprep.subr.msk.mxu0 %vm45_vm0, %v43_v1 }
  0x21   :  { %162 = vmatpush3.xpose.msk.msra.mxu0 %vm45_vm0, %v43_v1 }
  0x22   :  { %163 = vmatprep.subr.msk.mxu0 %vm45_vm0, %v42_v3 }
  0x25   :  { %164 = vmatpush3.xpose.msk.msra.mxu0 %vm45_vm0, %v42_v3 }
  0x26   :  { %165 = vmatprep.subr.msk.mxu0 %vm45_vm0, %v41_v4 }
  0x29   :  { %166 = vmatpush3.xpose.msk.msra.mxu0 %vm45_vm0, %v41_v4 }
  0x2c   :  { %168 = vmatmul.mubr.msk.f32.vlgmr.msra.gmra.mxu0 %vm45_vm0, %v40_v5 }
  0xec   :  { %v169_v6 = vpop.f32.mrf.mxu0 }
  0xed   :  { %140 = vst.msk [vmem:[%s263_s2 + $0x8] sm:$0xff] %vm45_vm0, %v169_v6 }
  0xee   :  { %v130_v7 = vpop.f32.mrf.mxu0 }
  0xef   :  { %139 = vst.msk [vmem:[%s263_s2] sm:$0xff] %vm45_vm0, %v130_v7 }
  0xf0   :  { %145 = vsyncpa [#allocation3], 1 }
  0xf1   :  { %146 = vsyncpa [#allocation5], 1 }

</bundles_post_ra>
